<compile_context>
chip_gen: v7x
topology: tpu7x:2x2x1
jax: 0.10.0
libtpu: 0.0.40
codegen_flags: <defaults>
</compile_context>

<pallas_src>
import functools

import jax
import jax.numpy as jnp
from jax.experimental import pallas as pl
from jax.experimental.pallas import tpu as pltpu

_LANE = 128      # fast (lane) axis quantum
_SUBLANE = 8     # slow (sublane) axis quantum


def _round_up(n, m):
    return ((n + m - 1) // m) * m


def _apply_activation(y, activation):
    if activation == "relu":
        return jnp.maximum(y, 0.0)
    if activation == "tanh":
        return jnp.tanh(y)
    if activation == "sigmoid":
        return jax.nn.sigmoid(y)
    if activation is None or activation == "identity":
        return y
    raise ValueError(f"unknown activation: {activation}")


def _fused_mlp_kernel(*refs, activations):
    """refs = (x_ref, w0, b0, w1, b1, ..., o_ref); all layers chained in VMEM/vregs."""
    x_ref = refs[0]
    o_ref = refs[-1]
    wb = refs[1:-1]
    n_layers = len(wb) // 2

    h = x_ref[...].astype(jnp.bfloat16)                  # bf16 operands for the MXU
    for i in range(n_layers):
        w = wb[2 * i][...]                               # (din_p, dout_p) bf16
        b = wb[2 * i + 1][...]                           # (1, dout_p) f32
        y = jnp.dot(h, w, preferred_element_type=jnp.float32)   # f32 accumulation
        y = y + b                                        # f32 bias (broadcast over rows)
        y = _apply_activation(y, activations[i])         # f32 epilogue (v5e-safe)
        if i < n_layers - 1:
            h = y.astype(jnp.bfloat16)
        else:
            o_ref[...] = y.astype(o_ref.dtype)


def _choose_tile_b(B, max_tile=1024):
    """Batch tile: >=2 grid steps (v7x megacore) with batch padding <= 8*steps-1 rows."""
    if B <= _SUBLANE:
        return _round_up(B, _SUBLANE)        # too small to split into 8-row tiles
    n_steps = max(2, pl.cdiv(B, max_tile))
    return _round_up(pl.cdiv(B, n_steps), _SUBLANE)


def _vmem_limit_bytes(tile_b, d0, d_out, padded_params):
    est = 2 * tile_b * d0 * 4                # input tile, double-buffered, f32
    est += 2 * tile_b * d_out * 4            # output tile, double-buffered, f32
    widest = d0
    for w_p, b_p in padded_params:           # single-buffered (pl.Buffered(1))
        est += w_p.nbytes + b_p.nbytes
        widest = max(widest, w_p.shape[1])
    est += 4 * tile_b * widest * 4           # intermediate activations / spill headroom
    # Floor at the 32 MiB default scoped limit, cap at v7x's 64 MiB physical VMEM.
    return int(min(64 << 20, max(32 << 20, 2 * est)))


def fused_mlp(x, padded_params, activations, *, max_tile_b=1024):
    """Run the whole MLP in one Pallas kernel.  Returns (B, out_features) f32."""
    B, d0 = x.shape
    assert padded_params[0][0].shape[0] == d0, "layer-0 weight must keep din unpadded"
    d_out = padded_params[-1][0].shape[1]

    tile_b = _choose_tile_b(B, max_tile_b)
    n_steps = pl.cdiv(B, tile_b)
    b_pad = n_steps * tile_b
    if b_pad != B:
        # At most 8*n_steps - 1 rows of zero padding (see _choose_tile_b).
        x = jnp.pad(x, ((0, b_pad - B), (0, 0)))

    resident = dict(pipeline_mode=pl.Buffered(1))   # grid-invariant -> single buffer
    in_specs = [pl.BlockSpec((tile_b, d0), lambda i: (i, 0))]
    operands = [x]
    for w_p, b_p in padded_params:
        din_p, dout_p = w_p.shape
        in_specs.append(pl.BlockSpec((din_p, dout_p), lambda i: (0, 0), **resident))
        in_specs.append(pl.BlockSpec((1, dout_p), lambda i: (0, 0), **resident))
        operands.extend([w_p, b_p])

    kernel = functools.partial(_fused_mlp_kernel, activations=tuple(activations))
    # TODO(synk): if hidden dims scale up and the kernel becomes MXU-bound on
    # v6e/v7x, pad/tile hidden dims to 256 (2x256 MXU) and add dout/K grid axes
    # with an f32 accumulator scratch instead of keeping every layer resident.
    out = pl.pallas_call(
        kernel,
        out_shape=jax.ShapeDtypeStruct((b_pad, d_out), jnp.float32),
        grid=(n_steps,),
        in_specs=in_specs,
        out_specs=pl.BlockSpec((tile_b, d_out), lambda i: (i, 0)),
        compiler_params=pltpu.CompilerParams(
            dimension_semantics=("parallel",),   # shard batch tiles across TCs (v7x)
            vmem_limit_bytes=_vmem_limit_bytes(tile_b, d0, d_out, padded_params),
        ),
    )(*operands)
    return out if b_pad == B else out[:B]


class FeedForwardNN:
    """JAX/Pallas re-implementation of the PyTorch FeedForwardNN.

    sizes: list of layer widths, e.g. [16, 32, 32, 8]
    activations: list of activation names (len(sizes) - 2), applied after every
                 Linear except the last.
    """

    def __init__(self, sizes, activations, key):
        assert len(activations) == len(sizes) - 2
        self.sizes = list(sizes)
        self.activations = list(activations) + [None]   # last layer: no activation
        n_layers = len(sizes) - 1
        self.params = []          # unpadded f32 (reference)
        self.padded_params = []   # bf16 weights, f32 (1, dout_p) biases
        for i in range(n_layers):
            key, wk, bk = jax.random.split(key, 3)
            din, dout = sizes[i], sizes[i + 1]
            bound = 1.0 / (din ** 0.5)                   # matches torch Linear init
            # Stored already transposed: (D_in, D_out)
            w = jax.random.uniform(wk, (din, dout), jnp.float32, -bound, bound)
            bias = jax.random.uniform(bk, (dout,), jnp.float32, -bound, bound)
            self.params.append((w, bias))

            # Layout: layer 0 keeps din unpadded (x DMA'd unpadded); the last
            # layer keeps dout unpadded (narrow f32 output store); hidden dims
            # are zero-padded to 128 lanes.  Padded weight rows/cols and bias
            # entries are zero so padded activation columns (possibly non-zero
            # after sigmoid) never reach real outputs.
            din_p = din if i == 0 else _round_up(din, _LANE)
            dout_p = dout if i == n_layers - 1 else _round_up(dout, _LANE)
            w_p = (jnp.zeros((din_p, dout_p), jnp.bfloat16)
                   .at[:din, :dout].set(w.astype(jnp.bfloat16)))
            b_p = (jnp.zeros((1, dout_p), jnp.float32).at[0, :dout].set(bias))
            self.padded_params.append((w_p, b_p))

    def __call__(self, x):
        return fused_mlp(x, self.padded_params, self.activations)


def reference_forward(params, activations, x):
    """Plain-JAX f32 reference for correctness checking."""
    for (w, bias), act in zip(params, activations):
        x = x @ w + bias
        x = _apply_activation(x, act)
    return x


if __name__ == "__main__":
    key = jax.random.PRNGKey(0)
    k_model, k_x = jax.random.split(key)

    sizes = [16, 32, 32, 8]
    activations = ["relu", "tanh"]
    batch = 8

    model = FeedForwardNN(sizes, activations, k_model)
    x = jax.random.normal(k_x, (batch, sizes[0]), jnp.float32)

    out = jax.block_until_ready(model(x))

    ref = reference_forward(model.params, model.activations, x)
    assert out.shape == (batch, sizes[-1])
    # bf16 matmul operands (f32 accumulation) -> loosened tolerance vs f32 ref.
    assert jnp.allclose(out, ref, atol=2e-2, rtol=2e-2), "mismatch vs reference"

    print("KERNEL_OK")
</pallas_src>

<mosaic_0001>
module attributes {stable_mosaic.version = 11 : i64} {
  func.func @_fused_mlp_kernel(%arg0: i32, %arg1: memref<8x16xf32, #tpu.memory_space<vmem>>, %arg2: memref<16x128xbf16, #tpu.memory_space<vmem>>, %arg3: memref<1x128xf32, #tpu.memory_space<vmem>>, %arg4: memref<128x128xbf16, #tpu.memory_space<vmem>>, %arg5: memref<1x128xf32, #tpu.memory_space<vmem>>, %arg6: memref<128x8xbf16, #tpu.memory_space<vmem>>, %arg7: memref<1x8xf32, #tpu.memory_space<vmem>>, %arg8: memref<8x8xf32, #tpu.memory_space<vmem>>) attributes {dimension_semantics = [#tpu.dimension_semantics<parallel>], iteration_bounds = array<i64: 1>, scalar_prefetch = 0 : i64, scratch_operands = 0 : i64, tpu.core_type = #tpu.core_type<tc>, window_params = [{transform_indices = @transform_0, window_bounds = array<i64: 8, 16>}, {pipeline_mode = #tpu.pipeline_mode<synchronous>, transform_indices = @transform_1, window_bounds = array<i64: 16, 128>}, {pipeline_mode = #tpu.pipeline_mode<synchronous>, transform_indices = @transform_2, window_bounds = array<i64: 1, 128>}, {pipeline_mode = #tpu.pipeline_mode<synchronous>, transform_indices = @transform_3, window_bounds = array<i64: 128, 128>}, {pipeline_mode = #tpu.pipeline_mode<synchronous>, transform_indices = @transform_4, window_bounds = array<i64: 1, 128>}, {pipeline_mode = #tpu.pipeline_mode<synchronous>, transform_indices = @transform_5, window_bounds = array<i64: 128, 8>}, {pipeline_mode = #tpu.pipeline_mode<synchronous>, transform_indices = @transform_6, window_bounds = array<i64: 1, 8>}, {transform_indices = @transform_7, window_bounds = array<i64: 8, 8>}]} {
    %c0 = arith.constant 0 : index
    %c0_0 = arith.constant 0 : index
    %0 = vector.load %arg1[%c0, %c0_0] : memref<8x16xf32, #tpu.memory_space<vmem>>, vector<8x16xf32>
    %1 = arith.truncf %0 : vector<8x16xf32> to vector<8x16xbf16>
    %c0_1 = arith.constant 0 : index
    %c0_2 = arith.constant 0 : index
    %2 = vector.load %arg2[%c0_1, %c0_2] : memref<16x128xbf16, #tpu.memory_space<vmem>>, vector<16x128xbf16>
    %c0_3 = arith.constant 0 : index
    %c0_4 = arith.constant 0 : index
    %3 = vector.load %arg3[%c0_3, %c0_4] : memref<1x128xf32, #tpu.memory_space<vmem>>, vector<1x128xf32>
    %cst = arith.constant dense<0.000000e+00> : vector<8x128xf32>
    %4 = tpu.matmul %1, %2, %cst {dimension_numbers = #tpu.dot_dimension_numbers<[1], [0], [0], [1], [0, 0, 1, 1], [], []>} : vector<8x16xbf16>, vector<16x128xbf16>, vector<8x128xf32> -> vector<8x128xf32>
    %5 = vector.broadcast %3 : vector<1x128xf32> to vector<8x128xf32>
    %6 = arith.addf %4, %5 : vector<8x128xf32>
    %cst_5 = arith.constant 0.000000e+00 : f32
    %7 = vector.broadcast %cst_5 : f32 to vector<8x128xf32>
    %8 = arith.maximumf %6, %7 : vector<8x128xf32>
    %9 = arith.truncf %8 : vector<8x128xf32> to vector<8x128xbf16>
    %c0_6 = arith.constant 0 : index
    %c0_7 = arith.constant 0 : index
    %10 = vector.load %arg4[%c0_6, %c0_7] : memref<128x128xbf16, #tpu.memory_space<vmem>>, vector<128x128xbf16>
    %c0_8 = arith.constant 0 : index
    %c0_9 = arith.constant 0 : index
    %11 = vector.load %arg5[%c0_8, %c0_9] : memref<1x128xf32, #tpu.memory_space<vmem>>, vector<1x128xf32>
    %cst_10 = arith.constant dense<0.000000e+00> : vector<8x128xf32>
    %12 = tpu.matmul %9, %10, %cst_10 {dimension_numbers = #tpu.dot_dimension_numbers<[1], [0], [0], [1], [0, 0, 1, 1], [], []>} : vector<8x128xbf16>, vector<128x128xbf16>, vector<8x128xf32> -> vector<8x128xf32>
    %13 = vector.broadcast %11 : vector<1x128xf32> to vector<8x128xf32>
    %14 = arith.addf %12, %13 : vector<8x128xf32>
    %15 = math.tanh %14 : vector<8x128xf32>
    %16 = arith.truncf %15 : vector<8x128xf32> to vector<8x128xbf16>
    %c0_11 = arith.constant 0 : index
    %c0_12 = arith.constant 0 : index
    %17 = vector.load %arg6[%c0_11, %c0_12] : memref<128x8xbf16, #tpu.memory_space<vmem>>, vector<128x8xbf16>
    %c0_13 = arith.constant 0 : index
    %c0_14 = arith.constant 0 : index
    %18 = vector.load %arg7[%c0_13, %c0_14] : memref<1x8xf32, #tpu.memory_space<vmem>>, vector<1x8xf32>
    %cst_15 = arith.constant dense<0.000000e+00> : vector<8x8xf32>
    %19 = tpu.matmul %16, %17, %cst_15 {dimension_numbers = #tpu.dot_dimension_numbers<[1], [0], [0], [1], [0, 0, 1, 1], [], []>} : vector<8x128xbf16>, vector<128x8xbf16>, vector<8x8xf32> -> vector<8x8xf32>
    %20 = vector.broadcast %18 : vector<1x8xf32> to vector<8x8xf32>
    %21 = arith.addf %19, %20 : vector<8x8xf32>
    %c0_16 = arith.constant 0 : index
    %c0_17 = arith.constant 0 : index
    %22 = vector.load %arg8[%c0_16, %c0_17] : memref<8x8xf32, #tpu.memory_space<vmem>>, vector<8x8xf32>
    tpu.vector_store %arg8[%c0_16, %c0_17], %21 {strides = array<i32>} : memref<8x8xf32, #tpu.memory_space<vmem>>, vector<8x8xf32>,
    return
  }
  func.func @transform_0(%arg0: i32) -> (i32, i32) {
    %c0_i32 = arith.constant 0 : i32
    %c0_i32_0 = arith.constant 0 : i32
    return %arg0, %c0_i32 : i32, i32
  }
  func.func @transform_1(%arg0: i32) -> (i32, i32) {
    %c0_i32 = arith.constant 0 : i32
    %c0_i32_0 = arith.constant 0 : i32
    %c0_i32_1 = arith.constant 0 : i32
    return %c0_i32, %c0_i32_0 : i32, i32
  }
  func.func @transform_2(%arg0: i32) -> (i32, i32) {
    %c0_i32 = arith.constant 0 : i32
    %c0_i32_0 = arith.constant 0 : i32
    %c0_i32_1 = arith.constant 0 : i32
    return %c0_i32, %c0_i32_0 : i32, i32
  }
  func.func @transform_3(%arg0: i32) -> (i32, i32) {
    %c0_i32 = arith.constant 0 : i32
    %c0_i32_0 = arith.constant 0 : i32
    %c0_i32_1 = arith.constant 0 : i32
    return %c0_i32, %c0_i32_0 : i32, i32
  }
  func.func @transform_4(%arg0: i32) -> (i32, i32) {
    %c0_i32 = arith.constant 0 : i32
    %c0_i32_0 = arith.constant 0 : i32
    %c0_i32_1 = arith.constant 0 : i32
    return %c0_i32, %c0_i32_0 : i32, i32
  }
  func.func @transform_5(%arg0: i32) -> (i32, i32) {
    %c0_i32 = arith.constant 0 : i32
    %c0_i32_0 = arith.constant 0 : i32
    %c0_i32_1 = arith.constant 0 : i32
    return %c0_i32, %c0_i32_0 : i32, i32
  }
  func.func @transform_6(%arg0: i32) -> (i32, i32) {
    %c0_i32 = arith.constant 0 : i32
    %c0_i32_0 = arith.constant 0 : i32
    %c0_i32_1 = arith.constant 0 : i32
    return %c0_i32, %c0_i32_0 : i32, i32
  }
  func.func @transform_7(%arg0: i32) -> (i32, i32) {
    %c0_i32 = arith.constant 0 : i32
    %c0_i32_0 = arith.constant 0 : i32
    return %arg0, %c0_i32 : i32, i32
  }
}

</mosaic_0001>

<bundles_post_ra>
// kernel: tpu_custom_call.1
= control target key start
LH: loop header
LB: loop body
LE: loop exit
PB: predicated region body
PF: predicated region fallthrough
CT: control target
= control target key end

     0   :  { %12 = vsyncpa [#allocation3], 0  ;;  %s656_s0 = inlined_call_operand.vmem [shape: f32[8,16], index: 0, kind: input, shape index: {}]   ;;  %s657_s1 = inlined_call_operand.hbm [shape: bf16[16,128], index: 1, kind: input, shape index: {}]   ;;  %s658_s2 = inlined_call_operand.vmem [shape: f32[1,128], index: 2, kind: input, shape index: {}]   ;;  %s659_s3 = inlined_call_operand.vmem [shape: bf16[128,128], index: 3, kind: input, shape index: {}]   ;;  %s660_s4 = inlined_call_operand.vmem [shape: f32[1,128], index: 4, kind: input, shape index: {}]   ;;  %s661_s5 = inlined_call_operand.vmem [shape: bf16[128,8], index: 5, kind: input, shape index: {}]   ;;  %s662_s6 = inlined_call_operand.vmem [shape: f32[1,8], index: 6, kind: input, shape index: {}]   ;;  %s663_s7 = inlined_call_operand.hbm [shape: f32[8,8], index: 7, kind: output, shape index: {}]  }
   0x1   :  { %13 = vsyncpa [#allocation4], 0  ;;  %s506_s24 = smov [#allocation2]   ;;  %s458_s28 = scalar_lea.hbm %s657_s1, 128 }
   0x2   :  { %s21_s25 = sshll.u32 %s506_s24, 4  ;;  %p459_p0 = scmp.ne.s32.totalorder %s657_s1, %s458_s28  ;;  %s22_s25 = int_to_ptr.vmem [resolvable:$true] %s21_s25 }
   0x3   :  { %p462_p1 = scmp.lt.u32.totalorder %s458_s28, %s657_s1 }
   0x5   :  { %p464_p2 = pnand %p462_p1, %p459_p0 }
   0x7   :  { %467 = shalt.err (!%p464_p2)
}
   0x8   :  { %s468_s10 = scalar_lea.vmem %s22_s25, 128  ;;  %p473_p4 = scmp.lt.s32.totalorder %s22_s25, %s22_s25 }
   0x9   :  { %p469_p3 = scmp.ne.s32.totalorder %s22_s25, %s468_s10  ;;  %p474_p5 = scmp.lt.s32.totalorder %s468_s10, %s468_s10 }
   0xb   :  { %p475_p6 = por %p474_p5, %p473_p4 }
   0xd   :  { %p476_p7 = pnand %p475_p6, %p469_p3 }
   0xf   :  { %479 = shalt.err (!%p476_p7)
}
  0x10   :  { %s507_s11 = smov 64   ;;  %s508_s12 = smov 4  }
  0x11   :  { %27 = dma.hbm_to_vmem [thread:$0]  %s657_s1, 128, %s22_s25, [#allocation3], %s507_s11, %s507_s11, %s508_s12  }
  0x12   :  { %502 = dma.done.wait [#allocation3], 128  }
  0x13   :  { %503 = vsyncadd [#allocation3], 4294967168  ;;  %v509_v0 = vmov 0.0   ;;  %vm510_vm0 = vmmov 0   ;;  %v439_v1 = vld [vmem:[#allocation2] sm:$0xff]   ;;  %vm59_vm1 = vcmask 130048  }
  0x14   :  { %387 = vmatprep.subr.bf16.mxu0 %v509_v0  ;;  %389 = vmatprep.mubr.msk.bf16.mxu0 %vm510_vm0, %v509_v0  ;;  %v42_v2 = vld [vmem:[%s656_s0] sm:$0xff]  ;;  %v441_v5 = vld [vmem:[%s659_s3 + $0x8] sm:$0xff]   ;;  %v442_v6 = vld [vmem:[%s659_s3 + $0x10] sm:$0xff]   ;;  %s511_s26 = smov [#allocation5]   ;;  %vm329_vm2 = vcmask 64512  }
  0x15   :  { %393 = vmatprep.subr.bf16.mxu1 %v509_v0  ;;  %409 = vmatprep.mubr.msk.bf16.mxu1 %vm510_vm0, %v509_v0  ;;  %v43_v3 = vpack.c.bf16 %v42_v2, %v42_v2  ;;  %v440_v4 = vld [vmem:[%s659_s3] sm:$0xff]   ;;  %v443_v7 = vld [vmem:[%s659_s3 + $0x18] sm:$0xff]   ;;  %v445_v9 = vld [vmem:[%s659_s3 + $0x28] sm:$0xff]  }
  0x16   :  { %388 = vmatpush3.bf16.msra.mxu0 %v439_v1  ;;  %394 = vmatpush3.bf16.msra.mxu1 %v440_v4  ;;  %v444_v8 = vld [vmem:[%s659_s3 + $0x20] sm:$0xff]   ;;  %v446_v10 = vld [vmem:[%s659_s3 + $0x30] sm:$0xff]   ;;  %v447_v11 = vld [vmem:[%s659_s3 + $0x38] sm:$0xff]  }
  0x17   :  { %413 = vmatprep.subr.bf16.mxu0 %v509_v0  ;;  %395 = vmatprep.subr.bf16.mxu1 %v509_v0  ;;  %v448_v12 = vld [vmem:[%s661_s5] sm:$0xff]   ;;  %v449_v13 = vld [vmem:[%s661_s5 + $0x8] sm:$0xff]   ;;  %v450_v14 = vld [vmem:[%s661_s5 + $0x10] sm:$0xff]  }
  0x18   :  { %v451_v15 = vld [vmem:[%s661_s5 + $0x18] sm:$0xff]   ;;  %v346_v16 = vld [vmem:[%s658_s2] ss:$0 sm:$0xff]  ;;  %v453_v25 = vld [vmem:[%s661_s5 + $0x28] sm:$0xff]  }
  0x19   :  { %390 = vmatmul.mubr.msk.bf16.vlgmr.msra.gmra.mrb[0].mxu0 %vm59_vm1, %v43_v3  ;;  %v452_v24 = vld [vmem:[%s661_s5 + $0x20] sm:$0xff]   ;;  %v454_v26 = vld [vmem:[%s661_s5 + $0x30] sm:$0xff]   ;;  %v455_v27 = vld [vmem:[%s661_s5 + $0x38] sm:$0xff]   ;;  %s337_s5 = sshll.u32 %s511_s26, 4  ;;  %s338_s5 = int_to_ptr.vmem [resolvable:$true] %s337_s5 }
  0x1a   :  { %429 = vmatprep.mubr.msk.bf16.mxu0 %vm510_vm0, %v509_v0  ;;  %396 = vmatpush3.bf16.msra.mxu1 %v441_v5  ;;  %v349_v28 = vld [vmem:[%s660_s4] ss:$0 sm:$0xff]  ;;  %s480_s4 = scalar_lea.vmem %s338_s5, 128  ;;  %p485_p9 = scmp.lt.s32.totalorder %s338_s5, %s338_s5 }
  0x1b   :  { %397 = vmatprep.subr.bf16.mxu1 %v509_v0  ;;  %414 = vmatpush3.bf16.msra.mxu0 %v448_v12  ;;  %v358_v36 = vld [vmem:[%s662_s6] ss:$0 sm:$0xff]  ;;  %p481_p8 = scmp.ne.s32.totalorder %s338_s5, %s480_s4  ;;  %p486_p10 = scmp.lt.s32.totalorder %s480_s4, %s480_s4 }
  0x1c   :  { %415 = vmatprep.subr.bf16.mxu0 %v509_v0 }
  0x1d   :  { %p487_p11 = por %p486_p10, %p485_p9 }
  0x1e   :  { %398 = vmatpush3.bf16.msra.mxu1 %v442_v6 }
  0x1f   :  { %399 = vmatprep.subr.bf16.mxu1 %v509_v0  ;;  %416 = vmatpush3.bf16.msra.mxu0 %v449_v13  ;;  %p488_p12 = pnand %p487_p11, %p481_p8 }
  0x20   :  { %417 = vmatprep.subr.bf16.mxu0 %v509_v0 }
  0x22   :  { %400 = vmatpush3.bf16.msra.mxu1 %v443_v7 }
  0x23   :  { %401 = vmatprep.subr.bf16.mxu1 %v509_v0  ;;  %418 = vmatpush3.bf16.msra.mxu0 %v450_v14 }
  0x24   :  { %419 = vmatprep.subr.bf16.mxu0 %v509_v0 }
  0x26   :  { %402 = vmatpush3.bf16.msra.mxu1 %v444_v8 }
  0x27   :  { %403 = vmatprep.subr.bf16.mxu1 %v509_v0  ;;  %420 = vmatpush3.bf16.msra.mxu0 %v451_v15 }
  0x28   :  { %421 = vmatprep.subr.bf16.mxu0 %v509_v0 }
  0x2a   :  { %404 = vmatpush3.bf16.msra.mxu1 %v445_v9 }
  0x2b   :  { %405 = vmatprep.subr.bf16.mxu1 %v509_v0  ;;  %422 = vmatpush3.bf16.msra.mxu0 %v452_v24 }
  0x2c   :  { %423 = vmatprep.subr.bf16.mxu0 %v509_v0 }
  0x2e   :  { %406 = vmatpush3.bf16.msra.mxu1 %v446_v10 }
  0x2f   :  { %407 = vmatprep.subr.bf16.mxu1 %v509_v0  ;;  %424 = vmatpush3.bf16.msra.mxu0 %v453_v25 }
  0x30   :  { %425 = vmatprep.subr.bf16.mxu0 %v509_v0 }
  0x32   :  { %408 = vmatpush3.bf16.msra.mxu1 %v447_v11 }
  0x33   :  { %426 = vmatpush3.bf16.msra.mxu0 %v454_v26 }
  0x34   :  { %427 = vmatprep.subr.bf16.mxu0 %v509_v0 }
  0x37   :  { %428 = vmatpush3.bf16.msra.mxu0 %v455_v27 }
  0xec   :  { %v97_v17 = vpop.f32.mrb[0].mxu0 }
  0xed   :  { %v98_v18 = vadd.f32 %v346_v16, %v97_v17  ;;  %v391_v19 = vpop.f32.mrb[1].mxu0 }
  0xee   :  { %v100_v20 = vpop.f32.mrb[2].mxu0 }
  0xef   :  { %v103_v21 = vmax.f32 %v98_v18, 0.0  ;;  %v392_v22 = vpop.f32.mrb[3].mxu0 }
  0xf1   :  { %v104_v23 = vpack.c.bf16 %v103_v21, %v103_v21 }
  0xf3   :  { %410 = vmatmul.mubr.bf16.vlgmr.msra.gmra.mrb[0].mxu1 %v104_v23 }
 0x1c6   :  { %v210_v29 = vpop.f32.mrb[0].mxu1 }
 0x1c7   :  { %v211_v30 = vadd.f32 %v349_v28, %v210_v29  ;;  %v411_v31 = vpop.f32.mrb[1].mxu1 }
 0x1c8   :  { %v213_v32 = vpop.f32.mrb[2].mxu1 }
 0x1c9   :  { %456 = vtanh.f32 %v211_v30  ;;  %v412_v33 = vpop.f32.mrb[3].mxu1 }
 0x1d3   :  { %v457_v34 = vpop.eup %456 }
 0x1d4   :  { %v217_v35 = vpack.c.bf16 %v457_v34, %v457_v34 }
 0x1d6   :  { %430 = vmatmul.mubr.bf16.vlgmr.msra.gmra.mrb[4].mxu0 %v217_v35 }
 0x2a9   :  { %v323_v37 = vpop.f32.mrb[4].mxu0 }
 0x2aa   :  { %v324_v38 = vadd.f32 %v358_v36, %v323_v37  ;;  %v431_v39 = vpop.f32.mrb[5].mxu0 }
 0x2ab   :  { %v326_v40 = vpop.f32.mrb[6].mxu0 }
 0x2ac   :  { %v432_v41 = vpop.f32.mrb[7].mxu0  ;;  %330 = vst.msk [vmem:[#allocation5] sm:$0xff] %vm329_vm2, %v324_v38 }
 0x2ad   :  { %491 = shalt.err (!%p488_p12)
}
 0x2ae   :  { %s492_s6 = scalar_lea.hbm %s663_s7, 128 }
 0x2af   :  { %p493_p13 = scmp.ne.s32.totalorder %s663_s7, %s492_s6  ;;  %p496_p0 = scmp.lt.u32.totalorder %s492_s6, %s663_s7 }
 0x2b1   :  { %p498_p1 = pnand %p496_p0, %p493_p13 }
 0x2b3   :  { %501 = shalt.err (!%p498_p1)
}
 0x2b4   :  { %340 = dma.vmem_to_hbm [thread:$0]  %s338_s5, 128, %s663_s7, [#allocation4]  }
 0x2b5   :  { %504 = dma.done.wait [#allocation4], 128  }
 0x2b6   :  { %505 = vsyncadd [#allocation4], 4294967168 }
 0x2b7   :  { %344 = vsyncpa [#allocation3], 1 }
 0x2b8   :  { %345 = vsyncpa [#allocation4], 1 }

</bundles_post_ra>
